<compile_context>
chip_gen: v6e
topology: v6e:2x2x1
jax: 0.10.0
libtpu: 0.0.40
codegen_flags: <defaults>
</compile_context>

<pallas_src>
import functools

import jax
import jax.numpy as jnp
from jax.experimental import pallas as pl
from jax.experimental.pallas import tpu as pltpu


def _connection_kernel(inter_w_ref, union_w_ref, inter_out_ref, union_out_ref,
                       *, training: bool):
    """Single-shot elementwise transform + batch broadcast.

    inter_w_ref   : (1, P*I)  VMEM  (lane-dense flattened weights)
    union_w_ref   : (1, I)    VMEM
    inter_out_ref : (B, P*I)  VMEM
    union_out_ref : (B, I)    VMEM
    """
    iw = inter_w_ref[...]
    uw = union_w_ref[...]
    if training:
        iw_t = jax.nn.sigmoid(iw)
        uw_t = jax.nn.sigmoid(uw)
    else:
        iw_t = (iw > 0).astype(jnp.float32)
        uw_t = (uw > 0).astype(jnp.float32)

    b = inter_out_ref.shape[0]
    # Sublane broadcast across the batch axis; computed once, stored once.
    inter_out_ref[...] = jnp.broadcast_to(
        iw_t, (b, iw_t.shape[1])).astype(inter_out_ref.dtype)
    union_out_ref[...] = jnp.broadcast_to(
        uw_t, (b, uw_t.shape[1])).astype(union_out_ref.dtype)


def csg_stump_connection_fixed_head(feature, intersection_w, union_w,
                                    is_training: bool):
    """JAX/Pallas equivalent of CSGStumpConnectionFixedHead.forward.

    feature        : (B, feature_dim)  float32  (only B is used)
    intersection_w : (P, I)            float32
    union_w        : (I,)              float32
    returns        : ((B, P, I), (B, I)) float32
    """
    B = feature.shape[0]
    P, I = intersection_w.shape
    PI = P * I

    # Lane-dense presentation: flatten (P, I) -> (1, P*I) in the wrapper
    # (free, contiguous reshape); the elementwise transform commutes with it.
    inter_flat = intersection_w.reshape(1, PI)
    union_2d = union_w.reshape(1, I)

    kernel = functools.partial(_connection_kernel, training=bool(is_training))

    inter_out_flat, union_out = pl.pallas_call(
        kernel,
        out_shape=(
            jax.ShapeDtypeStruct((B, PI), jnp.float32),
            jax.ShapeDtypeStruct((B, I), jnp.float32),
        ),
        in_specs=[
            pl.BlockSpec(memory_space=pltpu.MemorySpace.VMEM),
            pl.BlockSpec(memory_space=pltpu.MemorySpace.VMEM),
        ],
        out_specs=(
            pl.BlockSpec(memory_space=pltpu.MemorySpace.VMEM),
            pl.BlockSpec(memory_space=pltpu.MemorySpace.VMEM),
        ),
    )(inter_flat, union_2d)

    # Free reshape back to the PyTorch repeat() layout.
    return inter_out_flat.reshape(B, P, I), union_out


def _reference(feature, intersection_w, union_w, is_training):
    B = feature.shape[0]
    if is_training:
        iw = jax.nn.sigmoid(intersection_w)
        uw = jax.nn.sigmoid(union_w)
    else:
        iw = (intersection_w > 0).astype(jnp.float32)
        uw = (union_w > 0).astype(jnp.float32)
    return (jnp.broadcast_to(iw[None], (B,) + intersection_w.shape),
            jnp.broadcast_to(uw[None], (B,) + union_w.shape))


if __name__ == "__main__":
    # Module hyperparameters (small, consistent with the module's __init__).
    feature_dim = 32
    num_primitives = 16
    num_intersections = 32
    batch = 2

    key = jax.random.PRNGKey(0)
    k_feat, k_iw, k_uw = jax.random.split(key, 3)

    # Deterministic "nn.init.normal_" parameter initialization.
    feature = jax.random.normal(k_feat, (batch, feature_dim), dtype=jnp.float32)
    intersection_w = jax.random.normal(
        k_iw, (num_primitives, num_intersections), dtype=jnp.float32)
    union_w = jax.random.normal(k_uw, (num_intersections,), dtype=jnp.float32)

    ok = True
    for is_training in (True, False):
        inter_out, union_out = csg_stump_connection_fixed_head(
            feature, intersection_w, union_w, is_training)
        jax.block_until_ready(inter_out)
        jax.block_until_ready(union_out)

        ref_inter, ref_union = _reference(
            feature, intersection_w, union_w, is_training)
        ok &= bool(jnp.allclose(inter_out, ref_inter, atol=1e-6))
        ok &= bool(jnp.allclose(union_out, ref_union, atol=1e-6))
        ok &= inter_out.shape == (batch, num_primitives, num_intersections)
        ok &= union_out.shape == (batch, num_intersections)

    if ok:
        print("KERNEL_OK")
    else:
        print("KERNEL_MISMATCH")
</pallas_src>

<mosaic_0001>
module attributes {stable_mosaic.version = 11 : i64} {
  func.func @_connection_kernel(%arg0: memref<1x512xf32, #tpu.memory_space<vmem>>, %arg1: memref<1x32xf32, #tpu.memory_space<vmem>>, %arg2: memref<2x512xf32, #tpu.memory_space<vmem>>, %arg3: memref<2x32xf32, #tpu.memory_space<vmem>>) attributes {dimension_semantics = [], scalar_prefetch = 0 : i64, scratch_operands = 0 : i64, tpu.core_type = #tpu.core_type<tc>} {
    %c0 = arith.constant 0 : index
    %c0_0 = arith.constant 0 : index
    %0 = vector.load %arg0[%c0, %c0_0] : memref<1x512xf32, #tpu.memory_space<vmem>>, vector<1x512xf32>
    %c0_1 = arith.constant 0 : index
    %c0_2 = arith.constant 0 : index
    %1 = vector.load %arg1[%c0_1, %c0_2] : memref<1x32xf32, #tpu.memory_space<vmem>>, vector<1x32xf32>
    %2 = arith.negf %0 : vector<1x512xf32>
    %3 = math.exp %2 : vector<1x512xf32>
    %cst = arith.constant 1.000000e+00 : f32
    %4 = vector.broadcast %cst : f32 to vector<1x512xf32>
    %5 = arith.addf %4, %3 : vector<1x512xf32>
    %6 = arith.divf %4, %5 : vector<1x512xf32>
    %7 = arith.negf %1 : vector<1x32xf32>
    %8 = math.exp %7 : vector<1x32xf32>
    %cst_3 = arith.constant 1.000000e+00 : f32
    %9 = vector.broadcast %cst_3 : f32 to vector<1x32xf32>
    %10 = arith.addf %9, %8 : vector<1x32xf32>
    %11 = arith.divf %9, %10 : vector<1x32xf32>
    %12 = vector.shape_cast %6 : vector<1x512xf32> to vector<1x512xf32>
    %13 = vector.broadcast %12 : vector<1x512xf32> to vector<2x512xf32>
    %c0_4 = arith.constant 0 : index
    %c0_5 = arith.constant 0 : index
    %14 = vector.load %arg2[%c0_4, %c0_5] : memref<2x512xf32, #tpu.memory_space<vmem>>, vector<2x512xf32>
    tpu.vector_store %arg2[%c0_4, %c0_5], %13 {strides = array<i32>} : memref<2x512xf32, #tpu.memory_space<vmem>>, vector<2x512xf32>,
    %15 = vector.shape_cast %11 : vector<1x32xf32> to vector<1x32xf32>
    %16 = vector.broadcast %15 : vector<1x32xf32> to vector<2x32xf32>
    %c0_6 = arith.constant 0 : index
    %c0_7 = arith.constant 0 : index
    %17 = vector.load %arg3[%c0_6, %c0_7] : memref<2x32xf32, #tpu.memory_space<vmem>>, vector<2x32xf32>
    tpu.vector_store %arg3[%c0_6, %c0_7], %16 {strides = array<i32>} : memref<2x32xf32, #tpu.memory_space<vmem>>, vector<2x32xf32>,
    return
  }
}

</mosaic_0001>

<bundles_post_ra>
// kernel: tpu_custom_call.1
= control target key start
LH: loop header
LB: loop body
LE: loop exit
PB: predicated region body
PF: predicated region fallthrough
CT: control target
= control target key end

     0   :  { %9 = vsyncpa [#allocation3], 0  ;;  %s230_s0 = inlined_call_operand.hbm [shape: f32[1,512], index: 0, kind: input, shape index: {}]   ;;  %s231_s1 = inlined_call_operand.vmem [shape: f32[1,32], index: 1, kind: input, shape index: {}]   ;;  %s232_s2 = inlined_call_operand.hbm [shape: f32[2,512], index: 2, kind: output, shape index: {0}]   ;;  %s233_s3 = inlined_call_operand.hbm [shape: f32[2,32], index: 3, kind: output, shape index: {1}]  }
   0x1   :  { %10 = vsyncpa [#allocation4], 0 }
   0x2   :  { %11 = vsyncpa [#allocation7], 0  ;;  %s194_s12 = smov [#allocation2]  }
   0x3   :  { %s18_s13 = sshll.u32 %s194_s12, 4  ;;  %s19_s13 = int_to_ptr.vmem [resolvable:$true] %s18_s13 }
   0x4   :  { %s136_s14 = scalar_lea.vmem %s19_s13, 64  ;;  %p141_p1 = scmp.lt.s32.totalorder %s19_s13, %s19_s13 }
   0x5   :  { %p137_p0 = scmp.ne.s32.totalorder %s19_s13, %s136_s14  ;;  %p142_p2 = scmp.lt.s32.totalorder %s136_s14, %s136_s14 }
   0x7   :  { %p143_p3 = por %p142_p2, %p141_p1 }
   0x9   :  { %p144_p4 = pnand %p143_p3, %p137_p0 }
   0xb   :  { %147 = shalt.err (!%p144_p4)
}
   0xc   :  { %21 = dma.hbm_to_vmem [thread:$0]  %s230_s0, 64, %s19_s13, [#allocation3]  }
   0xd   :  { %188 = dma.done.wait [#allocation3], 64  }
   0xe   :  { %189 = vsyncadd [#allocation3], 4294967232  ;;  %v27_v0 = vld [vmem:[#allocation2] sm:$0xf]  ;;  %v42_v8 = vlaneseq  ;;  %v195_v9 = vmov 1983009808  }
   0xf   :  { %v28_v1 = vld [vmem:[%s231_s1] sm:$0x1]  ;;  %v114_v2 = vmul.f32 -1.442695, %v27_v0  ;;  %v61_v10 = vunpack.c.l.s4 %v195_v9  ;;  %s196_s0 = smov [#allocation6]   ;;  %vm83_vm0 = vcmask 254976  }
  0x10   :  { %v115_v3 = vmul.f32 -1.442695, %v28_v1  ;;  %v43_v11 = vshrl.u32 %v42_v8, 7  ;;  %s101_s1 = sshll.u32 %s196_s0, 4  ;;  %s197_s19 = smov [#allocation5]   ;;  %s102_s1 = int_to_ptr.vmem [resolvable:$true] %s101_s1 }
  0x11   :  { %120 = vpow2.f32 %v114_v2  ;;  %v62_v12 = vunpack.c.0.s8 %v61_v10  ;;  %s91_s20 = sshll.u32 %s197_s19, 4  ;;  %s148_s21 = scalar_lea.vmem %s102_s1, 32  ;;  %s92_s20 = int_to_ptr.vmem [resolvable:$true] %s91_s20 }
  0x12   :  { %122 = vpow2.f32 %v115_v3  ;;  %v44_v13 = vsub.s32 0, %v43_v11  ;;  %v48_v14 = vsub.s32 1, %v43_v11  ;;  %v52_v15 = vsub.s32 2, %v43_v11  ;;  %p149_p5 = scmp.ne.s32.totalorder %s102_s1, %s148_s21  ;;  %p153_p6 = scmp.lt.s32.totalorder %s102_s1, %s102_s1 }
  0x13   :  { %v56_v16 = vsub.s32 3, %v43_v11  ;;  %v65_v18 = vsub.s32 %v62_v12, %v43_v11  ;;  %p154_p7 = scmp.lt.s32.totalorder %s148_s21, %s148_s21 }
  0x15   :  { %p155_p8 = por %p154_p7, %p153_p6 }
  0x17   :  { %p156_p9 = pnand %p155_p8, %p149_p5 }
  0x1e   :  { %v121_v4 = vpop.eup %120 }
  0x1f   :  { %v123_v5 = vpop.eup %122  ;;  %v32_v6 = vadd.f32 1.0, %v121_v4 }
  0x20   :  { %v38_v7 = vadd.f32 1.0, %v123_v5 }
  0x21   :  { %124 = vrcp.f32 %v32_v6 }
  0x22   :  { %126 = vrcp.f32 %v38_v7 }
  0x2e   :  { %v125_v17 = vpop.eup %124 }
  0x2f   :  { %v127_v19 = vpop.eup %126  ;;  %v45_v20 = vrot.slane %v125_v17, %v44_v13  ;;  %v49_v21 = vrot.slane %v125_v17, %v48_v14  ;;  %v53_v22 = vrot.slane %v125_v17, %v52_v15  ;;  %v57_v23 = vrot.slane %v125_v17, %v56_v16 }
  0x30   :  { %v81_v24 = vrot.slane %v127_v19, %v44_v13 }
  0x31   :  { %v58_v25 = vcombine.low %v45_v20, %v49_v21  ;;  %v59_v26 = vcombine.low %v53_v22, %v57_v23 }
  0x32   :  { %84 = vst.msk [vmem:[#allocation6] sm:$0x3] %vm83_vm0, %v81_v24 }
  0x33   :  { %v66_v27 = vrot.slane %v58_v25, %v65_v18  ;;  %v73_v28 = vrot.slane %v59_v26, %v65_v18 }
  0x34   :  { %159 = shalt.err (!%p156_p9)
}
  0x35   :  { %104 = dma.vmem_to_hbm [thread:$0]  %s102_s1, 32, %s233_s3, [#allocation7]   ;;  %v74_v29 = vcombine.low %v66_v27, %v73_v28 }
  0x36   :  { %s168_s24 = scalar_lea.vmem %s92_s20, 128  ;;  %p173_p11 = scmp.lt.s32.totalorder %s92_s20, %s92_s20 }
  0x37   :  { %76 = vst [vmem:[#allocation5] sm:$0xff] %v74_v29  ;;  %p169_p10 = scmp.ne.s32.totalorder %s92_s20, %s168_s24  ;;  %p174_p12 = scmp.lt.s32.totalorder %s168_s24, %s168_s24 }
  0x39   :  { %p175_p13 = por %p174_p12, %p173_p11 }
  0x3b   :  { %p176_p0 = pnand %p175_p13, %p169_p10 }
  0x3d   :  { %179 = shalt.err (!%p176_p0)
}
  0x3e   :  { %94 = dma.vmem_to_hbm [thread:$0]  %s92_s20, 128, %s232_s2, [#allocation4]  }
  0x3f   :  { %190 = dma.done.wait [#allocation4], 128  }
  0x40   :  { %191 = vsyncadd [#allocation4], 4294967168 }
  0x41   :  { %192 = dma.done.wait [#allocation7], 32  }
  0x42   :  { %193 = vsyncadd [#allocation7], 4294967264 }
  0x43   :  { %111 = vsyncpa [#allocation3], 1 }
  0x44   :  { %112 = vsyncpa [#allocation4], 1 }
  0x45   :  { %113 = vsyncpa [#allocation7], 1 }

</bundles_post_ra>
